<compile_context>
chip_gen: v5e
topology: v5e:2x2
jax: 0.10.0
libtpu: 0.0.40
codegen_flags: <defaults>
</compile_context>

<pallas_src>
import functools

import jax
import jax.numpy as jnp
from jax.experimental import pallas as pl
from jax.experimental.pallas import tpu as pltpu

IN_FEATURES = 5
OUT_FEATURES = 4
BN_EPS = 1e-5

# Packed parameter slab layout, shape (OUT_FEATURES, IN_FEATURES + 3) = (4, 8):
#   cols 0..4 : W    (out_features, in_features)
#   col  5    : linear bias b
#   col  6    : BN gamma (weight)
#   col  7    : BN beta  (bias)
# Every parameter is a (4, 1) column aligned with the (4, B) lane-major
# activations, so no transposes/broadc「reshapes are needed inside the kernel.
_BIAS_COL = IN_FEATURES
_GAMMA_COL = IN_FEATURES + 1
_BETA_COL = IN_FEATURES + 2
_PACKED_COLS = IN_FEATURES + 3  # 8


def dummy_model_kernel(featT_ref, p_ref, logitsT_ref, loss_ref, *, batch_size):
    f = featT_ref[...]                       # (5, B) f32, batch on lanes
    p = p_ref[...]                           # (4, 8) f32 parameter slab
    inv_b = 1.0 / batch_size                 # true batch size (closure constant)
    bsz = float(batch_size)

    # Linear on the VPU (NOT the MXU): x = W @ f + b as 5 outer-product FMAs,
    # summed as a balanced tree so the products can co-issue.
    t0 = p[:, 0:1] * f[0:1, :] + p[:, 1:2] * f[1:2, :]
    t1 = p[:, 2:3] * f[2:3, :] + p[:, 3:4] * f[3:4, :]
    t2 = p[:, 4:5] * f[4:5, :] + p[:, _BIAS_COL:_BIAS_COL + 1]
    x = (t0 + t1) + t2                       # (4, B)

    # BatchNorm1d, training mode (biased batch statistics), one-pass moments.
    # s1 and s2 are independent -> 2 parallel cross-lane (XLU) reductions.
    s1 = jnp.sum(x, axis=1, keepdims=True)        # (4, 1)
    s2 = jnp.sum(x * x, axis=1, keepdims=True)    # (4, 1)
    mean = s1 * inv_b
    var = jnp.maximum(s2 * inv_b - mean * mean, 0.0)   # clamp: guard rsqrt

    # Fold gamma/beta and the normalization into one scale/shift.
    scale = p[:, _GAMMA_COL:_GAMMA_COL + 1] * jax.lax.rsqrt(var + BN_EPS)
    shift = p[:, _BETA_COL:_BETA_COL + 1] - mean * scale
    logitsT_ref[...] = x * scale + shift          # lane-dense (4, B) store

    # loss = sum(y): fold onto the already-reduced stats instead of re-reducing
    # the (4, B) tile.  sum_b y[j, b] = scale_j * s1_j + B * shift_j.
    loss_ref[0, 0] = jnp.sum(scale * s1 + bsz * shift)


def dummy_model_forward(feat, labels, params):
    """Forward pass of DummyModel. `labels` is accepted but unused (matches PyTorch)."""
    del labels  # loss = sum(logits); labels are ignored in the reference module.
    B = feat.shape[0]
    featT = feat.T  # (IN_FEATURES, B): put the batch on the lane axis (layout plumbing)

    kernel = functools.partial(dummy_model_kernel, batch_size=B)
    logits_t, loss = pl.pallas_call(
        kernel,
        out_shape=(
            jax.ShapeDtypeStruct((OUT_FEATURES, B), jnp.float32),  # logits^T (4, B)
            jax.ShapeDtypeStruct((1, 1), jnp.float32),             # scalar loss
        ),
        # Single grid point; full-array blocks are fine at these tiny shapes.
        in_specs=[
            pl.BlockSpec(memory_space=pltpu.VMEM),  # feat^T        (5, B)
            pl.BlockSpec(memory_space=pltpu.VMEM),  # packed params (4, 8)
        ],
        out_specs=(
            pl.BlockSpec(memory_space=pltpu.VMEM),  # logits^T (4, B)
            pl.BlockSpec(memory_space=pltpu.SMEM),  # loss (1, 1) on the scalar path
        ),
    )(featT, params["packed"])
    return dict(logits=logits_t.T, loss=loss[0, 0])


def pack_params(w, b, gamma, beta):
    """One-time layout: [W | b | gamma | beta] as columns of a (4, 8) slab."""
    return jnp.concatenate(
        [
            w,                                    # (4, 5)
            b.reshape(OUT_FEATURES, 1),
            gamma.reshape(OUT_FEATURES, 1),
            beta.reshape(OUT_FEATURES, 1),
        ],
        axis=1,
    ).astype(jnp.float32)                         # (4, 8)


def init_params():
    # Deterministic init matching nn.Linear(5,4) + nn.BatchNorm1d(4) defaults.
    kw, kb = jax.random.split(jax.random.PRNGKey(42))
    bound = 1.0 / (IN_FEATURES ** 0.5)
    w = jax.random.uniform(kw, (OUT_FEATURES, IN_FEATURES),
                           minval=-bound, maxval=bound, dtype=jnp.float32)
    b = jax.random.uniform(kb, (OUT_FEATURES,),
                           minval=-bound, maxval=bound, dtype=jnp.float32)
    gamma = jnp.ones((OUT_FEATURES,), jnp.float32)   # BatchNorm1d default weight
    beta = jnp.zeros((OUT_FEATURES,), jnp.float32)   # BatchNorm1d default bias
    return dict(packed=pack_params(w, b, gamma, beta),
                w=w, b=b, gamma=gamma, beta=beta)


# TODO(synk): PyTorch BatchNorm1d training mode also updates running_mean/running_var
# buffers; that state update is not emulated here (forward logits/loss parity only).


if __name__ == "__main__":
    B = 8
    key_feat, key_labels = jax.random.split(jax.random.PRNGKey(0))
    feat = jax.random.normal(key_feat, (B, IN_FEATURES), dtype=jnp.float32)
    labels = jax.random.randint(key_labels, (B,), 0, OUT_FEATURES)

    params = init_params()
    forward = jax.jit(dummy_model_forward)
    out = forward(feat, labels, params)
    jax.block_until_ready(out["logits"])
    jax.block_until_ready(out["loss"])

    # Sanity check against a pure-JAX reference of the same forward pass
    # (two-pass batch stats, like PyTorch's training-mode BatchNorm1d).
    x_ref = feat @ params["w"].T + params["b"]
    mean = x_ref.mean(axis=0, keepdims=True)
    var = ((x_ref - mean) ** 2).mean(axis=0, keepdims=True)
    y_ref = params["gamma"] * (x_ref - mean) / jnp.sqrt(var + BN_EPS) + params["beta"]
    assert out["logits"].shape == (B, OUT_FEATURES)
    assert jnp.allclose(out["logits"], y_ref, atol=1e-5, rtol=1e-5)
    assert jnp.allclose(out["loss"], jnp.sum(y_ref), atol=1e-4, rtol=1e-5)

    print("KERNEL_OK")
</pallas_src>

<mosaic_0001>
module attributes {stable_mosaic.version = 11 : i64} {
  func.func @dummy_model_kernel(%arg0: memref<5x8xf32, #tpu.memory_space<vmem>>, %arg1: memref<4x8xf32, #tpu.memory_space<vmem>>, %arg2: memref<4x8xf32, #tpu.memory_space<vmem>>, %arg3: memref<1x1xf32, #tpu.memory_space<smem>>) attributes {dimension_semantics = [], scalar_prefetch = 0 : i64, scratch_operands = 0 : i64, tpu.core_type = #tpu.core_type<tc>} {
    %c0 = arith.constant 0 : index
    %c0_0 = arith.constant 0 : index
    %0 = vector.load %arg0[%c0, %c0_0] : memref<5x8xf32, #tpu.memory_space<vmem>>, vector<5x8xf32>
    %c0_1 = arith.constant 0 : index
    %c0_2 = arith.constant 0 : index
    %1 = vector.load %arg1[%c0_1, %c0_2] : memref<4x8xf32, #tpu.memory_space<vmem>>, vector<4x8xf32>
    %2 = vector.extract_strided_slice %1 {offsets = [0, 0], sizes = [4, 1], strides = [1, 1]} : vector<4x8xf32> to vector<4x1xf32>
    %3 = vector.extract_strided_slice %0 {offsets = [0, 0], sizes = [1, 8], strides = [1, 1]} : vector<5x8xf32> to vector<1x8xf32>
    %4 = vector.broadcast %2 : vector<4x1xf32> to vector<4x8xf32>
    %5 = vector.broadcast %3 : vector<1x8xf32> to vector<4x8xf32>
    %6 = arith.mulf %4, %5 : vector<4x8xf32>
    %7 = vector.extract_strided_slice %1 {offsets = [0, 1], sizes = [4, 1], strides = [1, 1]} : vector<4x8xf32> to vector<4x1xf32>
    %8 = vector.extract_strided_slice %0 {offsets = [1, 0], sizes = [1, 8], strides = [1, 1]} : vector<5x8xf32> to vector<1x8xf32>
    %9 = vector.broadcast %7 : vector<4x1xf32> to vector<4x8xf32>
    %10 = vector.broadcast %8 : vector<1x8xf32> to vector<4x8xf32>
    %11 = arith.mulf %9, %10 : vector<4x8xf32>
    %12 = arith.addf %6, %11 : vector<4x8xf32>
    %13 = vector.extract_strided_slice %1 {offsets = [0, 2], sizes = [4, 1], strides = [1, 1]} : vector<4x8xf32> to vector<4x1xf32>
    %14 = vector.extract_strided_slice %0 {offsets = [2, 0], sizes = [1, 8], strides = [1, 1]} : vector<5x8xf32> to vector<1x8xf32>
    %15 = vector.broadcast %13 : vector<4x1xf32> to vector<4x8xf32>
    %16 = vector.broadcast %14 : vector<1x8xf32> to vector<4x8xf32>
    %17 = arith.mulf %15, %16 : vector<4x8xf32>
    %18 = vector.extract_strided_slice %1 {offsets = [0, 3], sizes = [4, 1], strides = [1, 1]} : vector<4x8xf32> to vector<4x1xf32>
    %19 = vector.extract_strided_slice %0 {offsets = [3, 0], sizes = [1, 8], strides = [1, 1]} : vector<5x8xf32> to vector<1x8xf32>
    %20 = vector.broadcast %18 : vector<4x1xf32> to vector<4x8xf32>
    %21 = vector.broadcast %19 : vector<1x8xf32> to vector<4x8xf32>
    %22 = arith.mulf %20, %21 : vector<4x8xf32>
    %23 = arith.addf %17, %22 : vector<4x8xf32>
    %24 = vector.extract_strided_slice %1 {offsets = [0, 4], sizes = [4, 1], strides = [1, 1]} : vector<4x8xf32> to vector<4x1xf32>
    %25 = vector.extract_strided_slice %0 {offsets = [4, 0], sizes = [1, 8], strides = [1, 1]} : vector<5x8xf32> to vector<1x8xf32>
    %26 = vector.broadcast %24 : vector<4x1xf32> to vector<4x8xf32>
    %27 = vector.broadcast %25 : vector<1x8xf32> to vector<4x8xf32>
    %28 = arith.mulf %26, %27 : vector<4x8xf32>
    %29 = vector.extract_strided_slice %1 {offsets = [0, 5], sizes = [4, 1], strides = [1, 1]} : vector<4x8xf32> to vector<4x1xf32>
    %30 = vector.broadcast %29 : vector<4x1xf32> to vector<4x8xf32>
    %31 = arith.addf %28, %30 : vector<4x8xf32>
    %32 = arith.addf %12, %23 : vector<4x8xf32>
    %33 = arith.addf %32, %31 : vector<4x8xf32>
    %cst = arith.constant dense<0.000000e+00> : vector<4xf32>
    %34 = vector.multi_reduction <add>, %33, %cst [1] : vector<4x8xf32> to vector<4xf32>
    %35 = vector.shape_cast %34 : vector<4xf32> to vector<4x1xf32>
    %36 = arith.mulf %33, %33 : vector<4x8xf32>
    %cst_3 = arith.constant dense<0.000000e+00> : vector<4xf32>
    %37 = vector.multi_reduction <add>, %36, %cst_3 [1] : vector<4x8xf32> to vector<4xf32>
    %38 = vector.shape_cast %37 : vector<4xf32> to vector<4x1xf32>
    %cst_4 = arith.constant 1.250000e-01 : f32
    %39 = vector.broadcast %cst_4 : f32 to vector<4x1xf32>
    %40 = arith.mulf %35, %39 : vector<4x1xf32>
    %cst_5 = arith.constant 1.250000e-01 : f32
    %41 = vector.broadcast %cst_5 : f32 to vector<4x1xf32>
    %42 = arith.mulf %38, %41 : vector<4x1xf32>
    %43 = arith.mulf %40, %40 : vector<4x1xf32>
    %44 = arith.subf %42, %43 : vector<4x1xf32>
    %cst_6 = arith.constant 0.000000e+00 : f32
    %45 = vector.broadcast %cst_6 : f32 to vector<4x1xf32>
    %46 = arith.maximumf %44, %45 : vector<4x1xf32>
    %47 = vector.extract_strided_slice %1 {offsets = [0, 6], sizes = [4, 1], strides = [1, 1]} : vector<4x8xf32> to vector<4x1xf32>
    %cst_7 = arith.constant 9.99999974E-6 : f32
    %48 = vector.broadcast %cst_7 : f32 to vector<4x1xf32>
    %49 = arith.addf %46, %48 : vector<4x1xf32>
    %50 = math.rsqrt %49 : vector<4x1xf32>
    %51 = arith.mulf %47, %50 : vector<4x1xf32>
    %52 = vector.extract_strided_slice %1 {offsets = [0, 7], sizes = [4, 1], strides = [1, 1]} : vector<4x8xf32> to vector<4x1xf32>
    %53 = arith.mulf %40, %51 : vector<4x1xf32>
    %54 = arith.subf %52, %53 : vector<4x1xf32>
    %55 = vector.broadcast %51 : vector<4x1xf32> to vector<4x8xf32>
    %56 = arith.mulf %33, %55 : vector<4x8xf32>
    %57 = vector.broadcast %54 : vector<4x1xf32> to vector<4x8xf32>
    %58 = arith.addf %56, %57 : vector<4x8xf32>
    %c0_8 = arith.constant 0 : index
    %c0_9 = arith.constant 0 : index
    %59 = vector.load %arg2[%c0_8, %c0_9] : memref<4x8xf32, #tpu.memory_space<vmem>>, vector<4x8xf32>
    tpu.vector_store %arg2[%c0_8, %c0_9], %58 {strides = array<i32>} : memref<4x8xf32, #tpu.memory_space<vmem>>, vector<4x8xf32>,
    %60 = arith.mulf %51, %35 : vector<4x1xf32>
    %cst_10 = arith.constant 8.000000e+00 : f32
    %61 = vector.broadcast %cst_10 : f32 to vector<4x1xf32>
    %62 = arith.mulf %61, %54 : vector<4x1xf32>
    %63 = arith.addf %60, %62 : vector<4x1xf32>
    %64 = vector.shape_cast %63 : vector<4x1xf32> to vector<1x4x1xf32>
    %cst_11 = arith.constant dense<0.000000e+00> : vector<1xf32>
    %65 = vector.multi_reduction <add>, %64, %cst_11 [1, 2] : vector<1x4x1xf32> to vector<1xf32>
    %66 = vector.shape_cast %65 : vector<1xf32> to vector<1x1x1xf32>
    %67 = vector.extract %66[0, 0, 0] : f32 from vector<1x1x1xf32>
    %c0_12 = arith.constant 0 : index
    %c0_13 = arith.constant 0 : index
    %68 = memref.load %arg3[%c0_12, %c0_13] : memref<1x1xf32, #tpu.memory_space<smem>>
    memref.store %67, %arg3[%c0_12, %c0_13] : memref<1x1xf32, #tpu.memory_space<smem>>
    return
  }
}

</mosaic_0001>

<bundles_post_ra>
// kernel: dummy_model_forward.1
= control target key start
LH: loop header
LB: loop body
LE: loop exit
PB: predicated region body
PF: predicated region fallthrough
CT: control target
= control target key end

     0   :  { %9 = vsyncpa [#allocation3], 0  ;;  %v222_v1 = vmov 2   ;;  %v223_v2 = vmov 0   ;;  %s280_s0 = inlined_call_operand.vmem [shape: f32[5,8], index: 0, kind: input, shape index: {}]   ;;  %s281_s1 = inlined_call_operand.vmem [shape: f32[4,8], index: 1, kind: input, shape index: {}]   ;;  %s282_s2 = inlined_call_operand.hbm [shape: f32[4,8], index: 2, kind: output, shape index: {0}]   ;;  %s283_s3 = inlined_call_operand.hbm [shape: f32[1,1], index: 3, kind: output, shape index: {1}]  }
   0x1   :  { %v258_v0 = vld [vmem:[%s281_s1] sm:$0xf]  ;;  %173 = vset.pattern.permute.xlu1 %v222_v1  ;;  %171 = vset.pattern.permute.xlu0 %v223_v2 }
   0x2   :  { %10 = vsyncpa [#allocation4], 0  ;;  %32 = vperm.xlu1 %173, %v258_v0   ;;  %19 = vperm.xlu0 %171, %v258_v0   ;;  %v224_v3 = vmov 4   ;;  %v225_v4 = vmov 3   ;;  %v226_v5 = vmov 1   ;;  %v227_v6 = vmov 5  }
   0x3   :  { %175 = vset.pattern.permute.xlu2 %v224_v3  ;;  %v15_v10 = vld [vmem:[%s280_s0] sm:$0x1f]  ;;  %vm57_vm0 = vcmask 60416   ;;  %v228_v32 = vmov 6   ;;  %s229_s0 = smov 1   ;;  %v230_v50 = vmov 7  }
   0x4   :  { %45 = vperm.xlu2 %175, %v258_v0   ;;  %v48_v11 = vperm.slane %v15_v10, 4  ;;  %v35_v12 = vperm.slane %v15_v10, 2  ;;  %v22_v13 = vperm.slane %v15_v10, 0  ;;  %v41_v14 = vperm.slane %v15_v10, 3  ;;  %s231_s15 = smov 127   ;;  %s232_s16 = smov 122  }
   0x5   :  { %v28_v15 = vperm.slane %v15_v10, 1  ;;  %vm112_vm4 = vcmask 3072   ;;  %s233_s17 = smov [#allocation2]   ;;  %s132_s21 = sshll.u32 %s282_s2, 4  ;;  %s133_s21 = int_to_ptr.hbm [resolvable:$true] %s132_s21 }
   0x6   :  { %s130_s18 = sshll.u32 %s233_s17, 4  ;;  %s141_s24 = sshll.u32 %s283_s3, 4  ;;  %s131_s18 = int_to_ptr.vmem [resolvable:$true] %s130_s18  ;;  %s142_s24 = int_to_ptr.hbm [resolvable:$true] %s141_s24 }
   0x7   :  { %s234_s26 = smov [#allocation5]  }
   0xa   :  { %174 = vset.pattern.permute.xlu1 %v225_v4  ;;  %172 = vset.pattern.permute.xlu0 %v226_v5 }
   0xb   :  { %38 = vperm.xlu1 %174, %v258_v0   ;;  %25 = vperm.xlu0 %172, %v258_v0  }
   0xc   :  { %176 = vset.pattern.permute.xlu2 %v227_v6 }
   0xd   :  { %51 = vperm.xlu2 %176, %v258_v0  }
  0x13   :  { %178 = vset.pattern.permute.xlu1 %v230_v50  ;;  %179 = vset.pattern.permute.xlu0 %v230_v50 }
  0x15   :  { %177 = vset.pattern.permute.xlu2 %v228_v32 }
  0x5e   :  { %v46_v9 = vpop.permute.xlu2 %45 }
  0x5f   :  { %v49_v16 = vmul.f32 %v48_v11, %v46_v9 }
  0x67   :  { %v52_v23 = vpop.permute.xlu2 %51 }
  0x68   :  { %v54_v26 = vadd.f32 %v52_v23, %v49_v16 }
  0x74   :  { %v33_v7 = vpop.permute.xlu1 %32  ;;  %v20_v8 = vpop.permute.xlu0 %19 }
  0x75   :  { %v36_v19 = vmul.f32 %v35_v12, %v33_v7  ;;  %v23_v20 = vmul.f32 %v22_v13, %v20_v8 }
  0x7d   :  { %v39_v17 = vpop.permute.xlu1 %38  ;;  %v26_v18 = vpop.permute.xlu0 %25 }
  0x7e   :  { %v42_v21 = vmul.f32 %v41_v14, %v39_v17  ;;  %v29_v22 = vmul.f32 %v28_v15, %v26_v18 }
  0x80   :  { %v43_v24 = vadd.f32 %v42_v21, %v36_v19  ;;  %v30_v25 = vadd.f32 %v29_v22, %v23_v20 }
  0x82   :  { %v55_v27 = vadd.f32 %v43_v24, %v30_v25 }
  0x84   :  { %v56_v28 = vadd.f32 %v55_v27, %v54_v26 }
  0x86   :  { %v58_v29 = vsel %vm57_vm0, %v56_v28, 0.0  ;;  %v61_v30 = vmul.f32 %v56_v28, %v56_v28 }
  0x87   :  { %59 = vadd.xlane.f32.xlu1 %v58_v29 }
  0x88   :  { %v62_v31 = vsel %vm57_vm0, %v61_v30, 0.0 }
  0x89   :  { %63 = vadd.xlane.f32.xlu2 %v62_v31 }
  0xfa   :  { %v60_v33 = vpop.xlane.xlu1 %59 }
  0xfb   :  { %v65_v34 = vmul.f32 0.125, %v60_v33 }
  0xfc   :  { %v64_v35 = vpop.xlane.xlu2 %63 }
  0xfd   :  { %v67_v36 = vmul.f32 %v65_v34, %v65_v34  ;;  %v66_v37 = vmul.f32 0.125, %v64_v35 }
  0xff   :  { %v68_v38 = vsub.f32 %v66_v37, %v67_v36 }
 0x101   :  { %v69_v39 = vmax.f32 %v68_v38, 0.0 }
 0x103   :  { %v70_v40 = vadd.f32 1e-05, %v69_v39 }
 0x105   :  { %180 = vrsqrt.f32 %v70_v40  ;;  %vm77_vm2 = vweird.f32 %v70_v40 }
 0x10b   :  { %v181_v41 = vpop.eup %180 }
 0x10c   :  { %v72_v42 = vmul.f32 %v181_v41, %v70_v40  ;;  %vm78_vm1 = vweird.f32 %v181_v41 }
 0x10d   :  { %vm79_vm3 = vmor %vm77_vm2, %vm78_vm1 }
 0x10e   :  { %v73_v43 = vmul.f32 %v181_v41, %v72_v42 }
 0x110   :  { %v74_v44 = vmul.f32 0.5, %v73_v43 }
 0x112   :  { %v75_v45 = vsub.f32 1.5, %v74_v44 }
 0x114   :  { %v76_v46 = vmul.f32 %v181_v41, %v75_v45 }
 0x116   :  { %v80_v47 = vsel %vm79_vm3, %v181_v41, %v76_v46 }
 0x117   :  { %v81_v48 = vmul.f32 %v80_v47, %v258_v0 }
 0x119   :  { %90 = vperm.xlu2 %177, %v81_v48   ;;  %v82_v49 = vmul.f32 %v81_v48, %v65_v34  ;;  %v101_v58 = vmul.f32 %v81_v48, %v60_v33 }
 0x11b   :  { %84 = vrot.lane.b32.xlu0 %v82_v49, %s229_s0 }
 0x173   :  { %v91_v54 = vpop.permute.xlu2 %90 }
 0x174   :  { %v93_v55 = vmul.f32 %v91_v54, %v56_v28 }
 0x18d   :  { %v85_v51 = vpop.permute.xlu0 %84 }
 0x18e   :  { %v87_v52 = vsub.f32 %v258_v0, %v85_v51 }
 0x190   :  { %v102_v53 = vmul.f32 8.0, %v87_v52  ;;  %96 = vperm.xlu1 %178, %v87_v52  }
 0x192   :  { %104 = vrot.lane.b32.xlu0 %v102_v53, %s231_s15 }
 0x202   :  { %v97_v56 = vpop.permute.xlu1 %96 }
 0x203   :  { %v99_v57 = vadd.f32 %v97_v56, %v93_v55 }
 0x204   :  { %v105_v59 = vpop.permute.xlu0 %104 }
 0x205   :  { %100 = vst.msk [vmem:[#allocation2] sm:$0xf] %vm57_vm0, %v99_v57  ;;  %v107_v60 = vadd.f32 %v105_v59, %v101_v58 }
 0x206   :  { %135 = dma.vmem_to_hbm [thread:$0]  %s131_s18, 64, %s133_s21, [#allocation3]  }
 0x207   :  { %109 = vrot.lane.b32.xlu0 %v107_v60, %s232_s16 }
 0x279   :  { %v110_v61 = vpop.permute.xlu0 %109 }
 0x27a   :  { %v113_v62 = vsel %vm112_vm4, %v110_v61, 0.0 }
 0x27b   :  { %114 = vadd.xlane.f32.xlu0 %v113_v62 }
 0x2ee   :  { %v115_v63 = vpop.xlane.xlu0 %114 }
 0x2ef   :  { %v116_v0 = vrot.slane %v115_v63, 4 }
 0x2f1   :  { %v117_v1 = vadd.f32 %v116_v0, %v115_v63 }
 0x2f3   :  { %v118_v2 = vrot.slane %v117_v1, 2 }
 0x2f5   :  { %v119_v3 = vadd.f32 %v118_v2, %v117_v1 }
 0x2f7   :  { %v120_v4 = vrot.slane %v119_v3, 1 }
 0x2f9   :  { %v121_v5 = vadd.f32 %v120_v4, %v119_v3 }
 0x2fb   :  { %156 = vpush %v121_v5 }
 0x32c   :  { %s157_s25 = spop %156 }
 0x32d   :  { %124 = sst [smem:[#allocation5]] %s157_s25 }
 0x32e   :  { %144 = dma.smem_to_hbm %s234_s26, 16, %s142_s24, [#allocation4]  }
 0x32f   :  { %218 = dma.done.wait [#allocation3], 64  }
 0x330   :  { %219 = vsyncadd [#allocation3], 4294967232 }
 0x331   :  { %220 = dma.done.wait [#allocation4], 16  }
 0x332   :  { %221 = vsyncadd [#allocation4], 4294967280 }
 0x333   :  { %153 = sfence }
 0x334   :  { %154 = vsyncpa [#allocation3], 1 }
 0x335   :  { %155 = vsyncpa [#allocation4], 1 }

</bundles_post_ra>
